<compile_context>
chip_gen: v6e
topology: v6e:2x2x1
jax: 0.10.0
libtpu: 0.0.40
codegen_flags: <defaults>
</compile_context>

<pallas_src>
import functools
import math

import jax
import jax.numpy as jnp
from jax.experimental import pallas as pl
from jax.experimental.pallas import tpu as pltpu


def _upsample_matrix(out_size, in_size):
    """Dense (out_size, in_size) 1-D bilinear interpolation matrix, align_corners=True
    (matches the module's explicit align_corners=True)."""
    if in_size == 1:
        return jnp.ones((out_size, 1), jnp.float32)
    if out_size == 1:
        return jnp.zeros((1, in_size), jnp.float32).at[0, 0].set(1.0)
    pos = jnp.arange(out_size, dtype=jnp.float32) * (in_size - 1) / (out_size - 1)
    lo = jnp.clip(jnp.floor(pos).astype(jnp.int32), 0, in_size - 2)
    frac = pos - lo.astype(jnp.float32)
    rows = jnp.arange(out_size)
    m = jnp.zeros((out_size, in_size), jnp.float32)
    m = m.at[rows, lo].add(1.0 - frac)
    m = m.at[rows, lo + 1].add(frac)
    return m


def _rows_per_step(n):
    """Batch elements stacked into the matmul M dimension per grid step: the largest
    divisor of n that still leaves >= 2 'parallel' grid steps (v7x has 2 TensorCores;
    irrelevant on v5e/v6e).  For the toy N=2 this is 1 (grid=(2,))."""
    best = 1
    for d in range(1, n + 1):
        if n % d == 0 and n // d >= 2:
            best = d
    return best


@functools.partial(jax.jit, static_argnames=("scale", "eps"))
def up_conv_with_activation(x_nchw, w_hwio, gamma, beta, *, scale=2, eps=1e-5):
    # x_nchw : (N, Cin, H, W) -- PyTorch layout in / out
    # w_hwio : (KH, KW, Cin, Cout)
    N, Cin, Hs, Ws = x_nchw.shape
    KH, KW, _, Cout = w_hwio.shape
    pad = 1                                        # module hardcodes Conv2d(padding=1)
    Ho = int(math.floor(Hs * scale))
    Wo = int(math.floor(Ws * scale))
    WoC = Wo * Cout                                # lane-dense output width (multiple of 128 here)
    Kin = Ws * Cin                                 # flattened (w, c) contraction axis
    Kpad = ((Kin + 127) // 128) * 128              # lane-align it (64 -> 128)

    nb = _rows_per_step(N)                         # batch rows stacked per grid step
    nsteps = N // nb

    # ---- wrapper-side constants (tiny, plain XLA) ----------------------------------------
    # 1) H-upsample with the conv's dy shift and zero-pad rows folded in: (Ho, KH*Hs), f32.
    #    uh_big[oy, dy*Hs + h] = UhPad[oy + dy, h]
    uh_pad = jnp.pad(_upsample_matrix(Ho, Hs), ((pad, pad), (0, 0)))            # (Ho+2, Hs)
    uh_big = jnp.concatenate([uh_pad[dy:dy + Ho] for dy in range(KH)], axis=1)  # (Ho, KH*Hs)

    # 2) W-upsample + zero-pad columns + conv W-taps folded into per-dy matrices, stacked
    #    along lanes:  mw[(w,c), dy*WoC + (ox,co)] = sum_dx UwPad[ox+dx, w] * W[dy, dx, c, co]
    uw_pad = jnp.pad(_upsample_matrix(Wo, Ws), ((pad, pad), (0, 0)))            # (Wo+2, Ws)
    uw_shift = jnp.stack([uw_pad[dx:dx + Wo] for dx in range(KW)], axis=0)      # (KW, Wo, Ws)
    m = jnp.einsum("dxw,ydco->ywcxo", uw_shift, w_hwio.astype(jnp.float32))     # (KH,Ws,Cin,Wo,Cout)
    mw = jnp.transpose(m, (1, 2, 0, 3, 4)).reshape(Kin, KH * WoC)
    mw = jnp.pad(mw, ((0, Kpad - Kin), (0, 0))).astype(jnp.bfloat16)            # (Kpad, KH*WoC)

    # 3) Lane-dense, lane-aligned channels-last input: (nsteps, nb*Hs, Kpad), bf16.
    x_flat = jnp.transpose(x_nchw, (0, 2, 3, 1)).reshape(N, Hs, Kin)
    x_flat = jnp.pad(x_flat, ((0, 0), (0, 0), (0, Kpad - Kin)))
    x_flat = x_flat.reshape(nsteps, nb * Hs, Kpad).astype(jnp.bfloat16)

    # ---- fused Pallas kernel: (upsample + pad + conv + ReLU + per-step BN partial stats) ---
    def kernel(x_ref, uh_ref, mw_ref, y_ref, sum_ref, sq_ref):
        # x_ref : (nb*Hs, Kpad) bf16           uh_ref: (Ho, KH*Hs) f32 (tiny, resident)
        # mw_ref: (Kpad, KH*WoC) bf16 (resident, constant index_map -> fetched once)
        # y_ref : (nb*Ho, WoC) bf16            sum_ref / sq_ref: (1, WoC) f32
        # Stage 1 (dominant matmul): width upsample + pad + conv W-taps for ALL stacked
        # batch rows at once.  bf16 operands, f32 accumulate.
        p = jnp.dot(x_ref[...], mw_ref[...], preferred_element_type=jnp.float32)  # (nb*Hs, KH*WoC)

        s_acc = jnp.zeros((1, WoC), jnp.float32)
        q_acc = jnp.zeros((1, WoC), jnp.float32)
        for b in range(nb):                       # nb is a small static Python int
            # Stage 2: height upsample + dy accumulation as ONE small f32 matmul.
            # All slice offsets are aligned: b*Hs (sublanes, mult. of 8), dy*WoC (lanes,
            # mult. of 128) -> pure vreg selection, no relayout.
            pcat = jnp.concatenate(
                [p[b * Hs:(b + 1) * Hs, dy * WoC:(dy + 1) * WoC] for dy in range(KH)],
                axis=0)                                                            # (KH*Hs, WoC)
            yb = jnp.dot(uh_ref[...], pcat, preferred_element_type=jnp.float32)   # (Ho, WoC)
            yb = jnp.maximum(yb, 0.0)             # ReLU (module order: conv -> ReLU -> BN)
            y_ref[b * Ho:(b + 1) * Ho, :] = yb.astype(y_ref.dtype)
            # Partial BN statistics while yb is still in vregs (reduced over H only; the
            # tiny remaining (steps, Wo, Cout) reduction is done in XLA so this grid axis
            # stays "parallel" / megacore-safe).
            s_acc = s_acc + jnp.sum(yb, axis=0, keepdims=True)
            q_acc = q_acc + jnp.sum(yb * yb, axis=0, keepdims=True)
        sum_ref[...] = s_acc
        sq_ref[...] = q_acc

    y_flat, sums, sqs = pl.pallas_call(
        kernel,
        out_shape=(
            jax.ShapeDtypeStruct((nsteps, nb * Ho, WoC), jnp.bfloat16),
            jax.ShapeDtypeStruct((nsteps, 1, WoC), jnp.float32),
            jax.ShapeDtypeStruct((nsteps, 1, WoC), jnp.float32),
        ),
        grid=(nsteps,),
        in_specs=[
            pl.BlockSpec((pl.Squeezed(), nb * Hs, Kpad), lambda n: (n, 0, 0)),
            pl.BlockSpec((Ho, KH * Hs), lambda n: (0, 0)),
            pl.BlockSpec((Kpad, KH * WoC), lambda n: (0, 0)),
        ],
        out_specs=(
            pl.BlockSpec((pl.Squeezed(), nb * Ho, WoC), lambda n: (n, 0, 0)),
            pl.BlockSpec((pl.Squeezed(), 1, WoC), lambda n: (n, 0, 0)),
            pl.BlockSpec((pl.Squeezed(), 1, WoC), lambda n: (n, 0, 0)),
        ),
        compiler_params=pltpu.CompilerParams(dimension_semantics=("parallel",)),
    )(x_flat, uh_big, mw)

    # ---- XLA epilogue: finalize BN batch stats, apply affine in f32, back to NCHW ----------
    # TODO(synk): the BN affine apply + NHWC->NCHW transpose stay in XLA because the batch
    # stats need a reduction across all grid steps; fold into a second tiny kernel only if
    # this HBM round trip shows up at deployment sizes.
    count = float(N * Ho * Wo)
    s = sums.sum(axis=(0, 1)).reshape(Wo, Cout).sum(axis=0)
    sq = sqs.sum(axis=(0, 1)).reshape(Wo, Cout).sum(axis=0)
    mean = s / count
    # Biased (training-mode) batch variance.  E[x^2]-E[x]^2 in f32 is fine at these sizes;
    # switch to centered two-pass sums for very large N*H*W.
    var = jnp.maximum(sq / count - mean * mean, 0.0)
    inv_std = jax.lax.rsqrt(var + eps)
    bn_scale = gamma.astype(jnp.float32) * inv_std
    bn_shift = beta.astype(jnp.float32) - mean * bn_scale

    y = y_flat.astype(jnp.float32).reshape(N, Ho, Wo, Cout) * bn_scale + bn_shift
    return jnp.transpose(y, (0, 3, 1, 2))                       # -> NCHW


if __name__ == "__main__":
    # UpConvWithActivation(in_channels=4, out_channels=8, kernel_size=3, scale=2,
    #                      mode='bilinear', batch_norm=True, activation=ReLU)
    N, Cin, Cout, Hs, Ws, KS, SCALE = 2, 4, 8, 16, 16, 3, 2

    key = jax.random.PRNGKey(0)
    kx, kw = jax.random.split(key)

    x_nchw = jax.random.normal(kx, (N, Cin, Hs, Ws), jnp.float32)

    # Deterministic synthetic parameters (not a checkpoint load).
    w_oihw = jax.random.normal(kw, (Cout, Cin, KS, KS), jnp.float32) * 0.1   # Conv2d weight
    w_hwio = jnp.transpose(w_oihw, (2, 3, 1, 0))                             # HWIO layout
    gamma = jnp.ones((Cout,), jnp.float32)    # BatchNorm2d default weight
    beta = jnp.zeros((Cout,), jnp.float32)    # BatchNorm2d default bias

    out = up_conv_with_activation(x_nchw, w_hwio, gamma, beta, scale=SCALE)
    out = jax.block_until_ready(out)

    assert out.shape == (N, Cout, Hs * SCALE, Ws * SCALE), out.shape
    assert bool(jnp.all(jnp.isfinite(out)))

    # Correctness check against a pure-XLA f32 reference of the same module.  Tolerance
    # accounts for bf16 operands in the dominant matmul and the bf16 y writeback, both
    # amplified by the BN 1/std (~3x) scaling.
    xr = jnp.transpose(x_nchw, (0, 2, 3, 1)).astype(jnp.float32)
    up = jnp.einsum("oh,nhwc,pw->nopc",
                    _upsample_matrix(Hs * SCALE, Hs), xr, _upsample_matrix(Ws * SCALE, Ws))
    conv = jax.lax.conv_general_dilated(up, w_hwio, (1, 1), "SAME",
                                        dimension_numbers=("NHWC", "HWIO", "NHWC"))
    act = jnp.maximum(conv, 0.0)
    m_ref = act.mean(axis=(0, 1, 2))
    v_ref = act.var(axis=(0, 1, 2))
    ref = (act - m_ref) * jax.lax.rsqrt(v_ref + 1e-5) * gamma + beta
    ref = jnp.transpose(ref, (0, 3, 1, 2))

    max_err = float(jnp.max(jnp.abs(out - ref)))
    mean_err = float(jnp.mean(jnp.abs(out - ref)))
    assert max_err < 0.15 and mean_err < 0.02, (max_err, mean_err)

    print("KERNEL_OK")
</pallas_src>

<mosaic_0001>
module attributes {stable_mosaic.version = 11 : i64} {
  func.func private @main(%arg0: i32) attributes {dimension_semantics = [#tpu.dimension_semantics<core_parallel>], iteration_bounds = array<i64: 2>, tpu.core_type = #tpu.core_type<sc_scalar_subcore>, window_params = []} {
    return
  }
}

module attributes {stable_mosaic.version = 11 : i64} {
  func.func private @main(%arg0: i32) attributes {dimension_semantics = [#tpu.dimension_semantics<core_parallel>], iteration_bounds = array<i64: 2>, tpu.core_type = #tpu.core_type<sc_scalar_subcore>, window_params = []} {
    return
  }
}

module attributes {stable_mosaic.version = 11 : i64} {
  func.func @kernel(%arg0: i32, %arg1: memref<1x16x128xbf16, #tpu.memory_space<vmem>>, %arg2: memref<32x48xf32, #tpu.memory_space<vmem>>, %arg3: memref<128x768xbf16, #tpu.memory_space<vmem>>, %arg4: memref<1x32x256xbf16, #tpu.memory_space<vmem>>, %arg5: memref<1x1x256xf32, #tpu.memory_space<vmem>>, %arg6: memref<1x1x256xf32, #tpu.memory_space<vmem>>) attributes {dimension_semantics = [#tpu.dimension_semantics<parallel>], iteration_bounds = array<i64: 2>, scalar_prefetch = 0 : i64, scratch_operands = 0 : i64, tpu.core_type = #tpu.core_type<tc>, window_params = [{transform_indices = @transform_0, window_bounds = array<i64: 1, 16, 128>}, {pipeline_mode = #tpu.pipeline_mode<synchronous>, transform_indices = @transform_1, window_bounds = array<i64: 32, 48>}, {pipeline_mode = #tpu.pipeline_mode<synchronous>, transform_indices = @transform_2, window_bounds = array<i64: 128, 768>}, {transform_indices = @transform_3, window_bounds = array<i64: 1, 32, 256>}, {transform_indices = @transform_4, window_bounds = array<i64: 1, 1, 256>}, {transform_indices = @transform_5, window_bounds = array<i64: 1, 1, 256>}]} {
    %c0 = arith.constant 0 : index
    %c0_0 = arith.constant 0 : index
    %c0_1 = arith.constant 0 : index
    %0 = vector.load %arg1[%c0, %c0_0, %c0_1] : memref<1x16x128xbf16, #tpu.memory_space<vmem>>, vector<1x16x128xbf16>
    %1 = vector.shape_cast %0 : vector<1x16x128xbf16> to vector<16x128xbf16>
    %c0_2 = arith.constant 0 : index
    %c0_3 = arith.constant 0 : index
    %2 = vector.load %arg3[%c0_2, %c0_3] : memref<128x768xbf16, #tpu.memory_space<vmem>>, vector<128x768xbf16>
    %cst = arith.constant dense<0.000000e+00> : vector<16x768xf32>
    %3 = tpu.matmul %1, %2, %cst {dimension_numbers = #tpu.dot_dimension_numbers<[1], [0], [0], [1], [0, 0, 1, 1], [], []>} : vector<16x128xbf16>, vector<128x768xbf16>, vector<16x768xf32> -> vector<16x768xf32>
    %cst_4 = arith.constant 0.000000e+00 : f32
    %4 = vector.broadcast %cst_4 : f32 to vector<1x256xf32>
    %cst_5 = arith.constant 0.000000e+00 : f32
    %5 = vector.broadcast %cst_5 : f32 to vector<1x256xf32>
    %6 = vector.extract_strided_slice %3 {offsets = [0, 0], sizes = [16, 256], strides = [1, 1]} : vector<16x768xf32> to vector<16x256xf32>
    %7 = vector.extract_strided_slice %3 {offsets = [0, 256], sizes = [16, 256], strides = [1, 1]} : vector<16x768xf32> to vector<16x256xf32>
    %8 = vector.extract_strided_slice %3 {offsets = [0, 512], sizes = [16, 256], strides = [1, 1]} : vector<16x768xf32> to vector<16x256xf32>
    %9 = tpu.concatenate %6, %7, %8 in 0 : vector<16x256xf32>, vector<16x256xf32>, vector<16x256xf32> -> vector<48x256xf32>
    %c0_6 = arith.constant 0 : index
    %c0_7 = arith.constant 0 : index
    %10 = vector.load %arg2[%c0_6, %c0_7] : memref<32x48xf32, #tpu.memory_space<vmem>>, vector<32x48xf32>
    %cst_8 = arith.constant dense<0.000000e+00> : vector<32x256xf32>
    %11 = tpu.matmul %10, %9, %cst_8 {dimension_numbers = #tpu.dot_dimension_numbers<[1], [0], [0], [1], [0, 0, 1, 1], [], []>} : vector<32x48xf32>, vector<48x256xf32>, vector<32x256xf32> -> vector<32x256xf32>
    %cst_9 = arith.constant 0.000000e+00 : f32
    %12 = vector.broadcast %cst_9 : f32 to vector<32x256xf32>
    %13 = arith.maximumf %11, %12 : vector<32x256xf32>
    %14 = arith.truncf %13 : vector<32x256xf32> to vector<32x256xbf16>
    %c0_10 = arith.constant 0 : index
    %c0_11 = arith.constant 0 : index
    %c0_12 = arith.constant 0 : index
    %15 = vector.load %arg4[%c0_10, %c0_11, %c0_12] : memref<1x32x256xbf16, #tpu.memory_space<vmem>>, vector<1x32x256xbf16>
    %16 = vector.shape_cast %15 : vector<1x32x256xbf16> to vector<32x256xbf16>
    %17 = vector.shape_cast %14 : vector<32x256xbf16> to vector<1x32x256xbf16>
    tpu.vector_store %arg4[%c0_10, %c0_11, %c0_12], %17 {strides = array<i32>} : memref<1x32x256xbf16, #tpu.memory_space<vmem>>, vector<1x32x256xbf16>,
    %cst_13 = arith.constant dense<0.000000e+00> : vector<256xf32>
    %18 = vector.multi_reduction <add>, %13, %cst_13 [0] : vector<32x256xf32> to vector<256xf32>
    %19 = vector.shape_cast %18 : vector<256xf32> to vector<1x256xf32>
    %20 = arith.addf %4, %19 : vector<1x256xf32>
    %21 = arith.mulf %13, %13 : vector<32x256xf32>
    %cst_14 = arith.constant dense<0.000000e+00> : vector<256xf32>
    %22 = vector.multi_reduction <add>, %21, %cst_14 [0] : vector<32x256xf32> to vector<256xf32>
    %23 = vector.shape_cast %22 : vector<256xf32> to vector<1x256xf32>
    %24 = arith.addf %5, %23 : vector<1x256xf32>
    %c0_15 = arith.constant 0 : index
    %c0_16 = arith.constant 0 : index
    %c0_17 = arith.constant 0 : index
    %25 = vector.load %arg5[%c0_15, %c0_16, %c0_17] : memref<1x1x256xf32, #tpu.memory_space<vmem>>, vector<1x1x256xf32>
    %26 = vector.shape_cast %25 : vector<1x1x256xf32> to vector<1x256xf32>
    %27 = vector.shape_cast %20 : vector<1x256xf32> to vector<1x1x256xf32>
    tpu.vector_store %arg5[%c0_15, %c0_16, %c0_17], %27 {strides = array<i32>} : memref<1x1x256xf32, #tpu.memory_space<vmem>>, vector<1x1x256xf32>,
    %c0_18 = arith.constant 0 : index
    %c0_19 = arith.constant 0 : index
    %c0_20 = arith.constant 0 : index
    %28 = vector.load %arg6[%c0_18, %c0_19, %c0_20] : memref<1x1x256xf32, #tpu.memory_space<vmem>>, vector<1x1x256xf32>
    %29 = vector.shape_cast %28 : vector<1x1x256xf32> to vector<1x256xf32>
    %30 = vector.shape_cast %24 : vector<1x256xf32> to vector<1x1x256xf32>
    tpu.vector_store %arg6[%c0_18, %c0_19, %c0_20], %30 {strides = array<i32>} : memref<1x1x256xf32, #tpu.memory_space<vmem>>, vector<1x1x256xf32>,
    return
  }
  func.func @transform_0(%arg0: i32) -> (i32, i32, i32) {
    %c0_i32 = arith.constant 0 : i32
    %c0_i32_0 = arith.constant 0 : i32
    %c0_i32_1 = arith.constant 0 : i32
    return %arg0, %c0_i32, %c0_i32_0 : i32, i32, i32
  }
  func.func @transform_1(%arg0: i32) -> (i32, i32) {
    %c0_i32 = arith.constant 0 : i32
    %c0_i32_0 = arith.constant 0 : i32
    %c0_i32_1 = arith.constant 0 : i32
    return %c0_i32, %c0_i32_0 : i32, i32
  }
  func.func @transform_2(%arg0: i32) -> (i32, i32) {
    %c0_i32 = arith.constant 0 : i32
    %c0_i32_0 = arith.constant 0 : i32
    %c0_i32_1 = arith.constant 0 : i32
    return %c0_i32, %c0_i32_0 : i32, i32
  }
  func.func @transform_3(%arg0: i32) -> (i32, i32, i32) {
    %c0_i32 = arith.constant 0 : i32
    %c0_i32_0 = arith.constant 0 : i32
    %c0_i32_1 = arith.constant 0 : i32
    return %arg0, %c0_i32, %c0_i32_0 : i32, i32, i32
  }
  func.func @transform_4(%arg0: i32) -> (i32, i32, i32) {
    %c0_i32 = arith.constant 0 : i32
    %c0_i32_0 = arith.constant 0 : i32
    %c0_i32_1 = arith.constant 0 : i32
    return %arg0, %c0_i32, %c0_i32_0 : i32, i32, i32
  }
  func.func @transform_5(%arg0: i32) -> (i32, i32, i32) {
    %c0_i32 = arith.constant 0 : i32
    %c0_i32_0 = arith.constant 0 : i32
    %c0_i32_1 = arith.constant 0 : i32
    return %arg0, %c0_i32, %c0_i32_0 : i32, i32, i32
  }
}

</mosaic_0001>

<bundles_post_ra>
// kernel: up_conv_with_activation.1
= control target key start
LH: loop header
LB: loop body
LE: loop exit
PB: predicated region body
PF: predicated region fallthrough
CT: control target
= control target key end

     0   :  { %s1222_s18 = smov 0   ;;  %s1418_s0 = inlined_call_operand.vmem [shape: bf16[2,16,128], index: 0, kind: input, shape index: {}]   ;;  %s1419_s1 = inlined_call_operand.vmem [shape: f32[32,48], index: 1, kind: input, shape index: {}]   ;;  %s1420_s2 = inlined_call_operand.vmem [shape: bf16[128,768], index: 2, kind: input, shape index: {}]   ;;  %s1421_s3 = inlined_call_operand.vmem [shape: bf16[2,32,256], index: 3, kind: output, shape index: {0}]   ;;  %s1422_s4 = inlined_call_operand.vmem [shape: f32[2,1,256], index: 4, kind: output, shape index: {1}]   ;;  %s1423_s5 = inlined_call_operand.vmem [shape: f32[2,1,256], index: 5, kind: output, shape index: {2}]  }
   0x1 LB: > { %s1021_s19 = sadd.s32 4294967295, %s1187_s18   ;;  %p1025_p0 = scmp.ge.s32.totalorder %s1187_s18, 1  ;;  %s1187_s18 = sphi %s1222_s18, %s16_s18  }
   0x2   : > { %p192_p1 = scmp.lt.s32.totalorder %s1187_s18, 3 }
   0x4   : > { %p193_p2 = pnand %p1025_p0, %p192_p1 }
   0x5   : > { %p228_p3 = scmp.lt.s32.totalorder (!%p193_p2), %s1021_s19, 1 }
   0x6   : > { %196 = sbr.rel (%p193_p2) target bundleno = 521 (0x209), region = 32 }
   0xb   : > { %v1108_v0 = vld [vmem:[%s1420_s2 + $0x154] ss:$24 sps:$4 sm:$0xff]   ;;  %v1110_v1 = vld [vmem:[%s1420_s2 + $0x150] ss:$24 sps:$4 sm:$0xff]   ;;  %v1189_v2 = vmov 0   ;;  %s1425_s19 = smov (!%p228_p3, %s1021_s19), 1 }
   0xc   : > { %575 = vmatprep.mubr.bf16.mxu0 %v1189_v2  ;;  %618 = vmatprep.mubr.bf16.mxu1 %v1189_v2  ;;  %v1111_v3 = vld [vmem:[%s1420_s2 + $0x124] ss:$24 sps:$4 sm:$0xff]   ;;  %v1113_v4 = vld [vmem:[%s1420_s2 + $0x120] ss:$24 sps:$4 sm:$0xff]   ;;  %v1114_v5 = vld [vmem:[%s1420_s2 + $0xf4] ss:$24 sps:$4 sm:$0xff]  }
   0xd   : > { %543 = vmatprep.subr.bf16.mxu0 %v1108_v0  ;;  %v1116_v6 = vld [vmem:[%s1420_s2 + $0xf0] ss:$24 sps:$4 sm:$0xff]   ;;  %v1117_v7 = vld [vmem:[%s1420_s2 + $0xc4] ss:$24 sps:$4 sm:$0xff]   ;;  %s1091_s9 = sshll.u32 %s1425_s19, 3  ;;  %v1190_v50 = vmov 0.0  }
   0xe   : > { %544 = vmatpush1.bf16.msra.mxu0 %v1110_v1  ;;  %v1119_v8 = vld [vmem:[%s1420_s2 + $0xc0] ss:$24 sps:$4 sm:$0xff]   ;;  %v1132_v9 = vld [vmem:[%s1420_s2 + $0x15c] ss:$24 sps:$4 sm:$0xff]   ;;  %s1268_s20 = scalar_lea.vmem %s1418_s0, %s1091_s9  ;;  %v1122_v12 = vld [vmem:[%s1420_s2 + $0x90] ss:$24 sps:$4 sm:$0xff]  }
   0xf   : > { %545 = vmatprep.subr.bf16.mxu0 %v1111_v3  ;;  %v1134_v10 = vld [vmem:[%s1420_s2 + $0x158] ss:$24 sps:$4 sm:$0xff]   ;;  %v1120_v11 = vld [vmem:[%s1420_s2 + $0x94] ss:$24 sps:$4 sm:$0xff]   ;;  %586 = vmatprep.subr.bf16.mxu1 %v1132_v9  ;;  %v1141_v14 = vld [vmem:[%s1420_s2 + $0x128] ss:$24 sps:$4 sm:$0xff]  }
  0x10   : > { %587 = vmatpush1.bf16.msra.mxu1 %v1134_v10  ;;  %v1139_v13 = vld [vmem:[%s1420_s2 + $0x12c] ss:$24 sps:$4 sm:$0xff]   ;;  %v1145_v16 = vld [vmem:[%s1420_s2 + $0xfc] ss:$24 sps:$4 sm:$0xff]   ;;  %v1147_v17 = vld [vmem:[%s1420_s2 + $0xf8] ss:$24 sps:$4 sm:$0xff]  }
  0x11   : > { %v1123_v15 = vld [vmem:[%s1420_s2 + $0x64] ss:$24 sps:$4 sm:$0xff]   ;;  %588 = vmatprep.subr.bf16.mxu1 %v1139_v13  ;;  %v1125_v18 = vld [vmem:[%s1420_s2 + $0x60] ss:$24 sps:$4 sm:$0xff]   ;;  %v1126_v19 = vld [vmem:[%s1420_s2 + $0x34] ss:$24 sps:$4 sm:$0xff]  }
  0x12   : > { %546 = vmatpush1.bf16.msra.mxu0 %v1113_v4  ;;  %v1151_v20 = vld [vmem:[%s1420_s2 + $0xcc] ss:$24 sps:$4 sm:$0xff]   ;;  %v1153_v21 = vld [vmem:[%s1420_s2 + $0xc8] ss:$24 sps:$4 sm:$0xff]   ;;  %v1157_v23 = vld [vmem:[%s1420_s2 + $0x9c] ss:$24 sps:$4 sm:$0xff]  }
  0x13   : > { %547 = vmatprep.subr.bf16.mxu0 %v1114_v5  ;;  %v1128_v22 = vld [vmem:[%s1420_s2 + $0x30] ss:$24 sps:$4 sm:$0xff]   ;;  %v1129_v24 = vld [vmem:[%s1420_s2 + $0x4] ss:$24 sps:$4 sm:$0xff]   ;;  %v1131_v26 = vld [vmem:[%s1420_s2] ss:$24 sps:$4 sm:$0xff]  }
  0x14   : > { %589 = vmatpush1.bf16.msra.mxu1 %v1141_v14  ;;  %v1159_v25 = vld [vmem:[%s1420_s2 + $0x98] ss:$24 sps:$4 sm:$0xff]   ;;  %v1163_v27 = vld [vmem:[%s1420_s2 + $0x6c] ss:$24 sps:$4 sm:$0xff]   ;;  %v1165_v30 = vld [vmem:[%s1420_s2 + $0x68] ss:$24 sps:$4 sm:$0xff]  }
  0x15   : > { %590 = vmatprep.subr.bf16.mxu1 %v1145_v16  ;;  %v1138_v28 = vld [vmem:[%s1420_s2 + $0x164] ss:$24 sps:$4 sm:$0xff]   ;;  %v1136_v31 = vld [vmem:[%s1420_s2 + $0x160] ss:$24 sps:$4 sm:$0xff]   ;;  %v1144_v33 = vld [vmem:[%s1420_s2 + $0x134] ss:$24 sps:$4 sm:$0xff]  }
  0x16   : > { %548 = vmatpush1.bf16.msra.mxu0 %v1116_v6  ;;  %v1135_v29 = vld [vmem:[%s1268_s20] sm:$0xff]   ;;  %v1169_v32 = vld [vmem:[%s1420_s2 + $0x3c] ss:$24 sps:$4 sm:$0xff]   ;;  %v1171_v34 = vld [vmem:[%s1420_s2 + $0x38] ss:$24 sps:$4 sm:$0xff]   ;;  %vm676_vm0 = vcmask 392192  }
  0x17   : > { %549 = vmatprep.subr.bf16.mxu0 %v1117_v7  ;;  %v1142_v35 = vld [vmem:[%s1420_s2 + $0x130] ss:$24 sps:$4 sm:$0xff]   ;;  %v1175_v36 = vld [vmem:[%s1420_s2 + $0xc] ss:$24 sps:$4 sm:$0xff]   ;;  %v1148_v39 = vld [vmem:[%s1420_s2 + $0x100] ss:$24 sps:$4 sm:$0xff]  }
  0x18   : > { %591 = vmatpush1.bf16.msra.mxu1 %v1147_v17  ;;  %v1150_v37 = vld [vmem:[%s1420_s2 + $0x104] ss:$24 sps:$4 sm:$0xff]   ;;  %v1177_v38 = vld [vmem:[%s1420_s2 + $0x8] ss:$24 sps:$4 sm:$0xff]   ;;  %v1156_v40 = vld [vmem:[%s1420_s2 + $0xd4] ss:$24 sps:$4 sm:$0xff]  }
  0x19   : > { %592 = vmatprep.subr.bf16.mxu1 %v1151_v20  ;;  %v1154_v41 = vld [vmem:[%s1420_s2 + $0xd0] ss:$24 sps:$4 sm:$0xff]   ;;  %v1162_v42 = vld [vmem:[%s1420_s2 + $0xa4] ss:$24 sps:$4 sm:$0xff]   ;;  %v1160_v43 = vld [vmem:[%s1420_s2 + $0xa0] ss:$24 sps:$4 sm:$0xff]  }
  0x1a   : > { %550 = vmatpush1.bf16.msra.mxu0 %v1119_v8  ;;  %v1168_v44 = vld [vmem:[%s1420_s2 + $0x74] ss:$24 sps:$4 sm:$0xff]   ;;  %v1166_v45 = vld [vmem:[%s1420_s2 + $0x70] ss:$24 sps:$4 sm:$0xff]   ;;  %v1174_v46 = vld [vmem:[%s1420_s2 + $0x44] ss:$24 sps:$4 sm:$0xff]  }
  0x1b   : > { %551 = vmatprep.subr.bf16.mxu0 %v1120_v11  ;;  %v1172_v47 = vld [vmem:[%s1420_s2 + $0x40] ss:$24 sps:$4 sm:$0xff]   ;;  %v1180_v48 = vld [vmem:[%s1420_s2 + $0x14] ss:$24 sps:$4 sm:$0xff]   ;;  %v1178_v49 = vld [vmem:[%s1420_s2 + $0x10] ss:$24 sps:$4 sm:$0xff]  }
  0x1c   : > { %593 = vmatpush1.bf16.msra.mxu1 %v1153_v21  ;;  %v672_v63 = vld [vmem:[%s1419_s1] sm:$0xff]  ;;  %v673_v0 = vld [vmem:[%s1419_s1 + $0x8] sm:$0xff]  ;;  %v674_v1 = vld [vmem:[%s1419_s1 + $0x10] sm:$0xff]  ;;  %s1092_s12 = sshll.u32 %s1425_s19, 5  ;;  %s1030_s16 = sshll.u32 %s1425_s19, 1 }
  0x1d   : > { %594 = vmatprep.subr.bf16.mxu1 %v1157_v23  ;;  %s1402_s15 = scalar_lea.vmem %s1421_s3, %s1092_s12  ;;  %s241_s21 = scalar_lea.vmem %s1422_s4, %s1030_s16 }
  0x1e   : > { %552 = vmatpush1.bf16.msra.mxu0 %v1122_v12  ;;  %s245_s24 = scalar_lea.vmem %s1423_s5, %s1030_s16 }
  0x1f   : > { %553 = vmatprep.subr.bf16.mxu0 %v1123_v15 }
  0x20   : > { %595 = vmatpush1.bf16.msra.mxu1 %v1159_v25 }
  0x21   : > { %596 = vmatprep.subr.bf16.mxu1 %v1163_v27 }
  0x22   : > { %554 = vmatpush1.bf16.msra.mxu0 %v1125_v18 }
  0x23   : > { %555 = vmatprep.subr.bf16.mxu0 %v1126_v19 }
  0x24   : > { %597 = vmatpush1.bf16.msra.mxu1 %v1165_v30 }
  0x25   : > { %598 = vmatprep.subr.bf16.mxu1 %v1169_v32 }
  0x26   : > { %556 = vmatpush1.bf16.msra.mxu0 %v1128_v22 }
  0x27   : > { %557 = vmatprep.subr.bf16.mxu0 %v1129_v24 }
  0x28   : > { %599 = vmatpush1.bf16.msra.mxu1 %v1171_v34 }
  0x29   : > { %600 = vmatprep.subr.bf16.mxu1 %v1175_v36 }
  0x2a   : > { %558 = vmatpush1.bf16.msra.mxu0 %v1131_v26 }
  0x2b   : > { %629 = vmatprep.subr.bf16.mxu0 %v1138_v28 }
  0x2c   : > { %601 = vmatpush1.bf16.msra.mxu1 %v1177_v38 }
  0x2d   : > { %576 = vmatmul.mubr.bf16.vlgmr.msra.gmra.mxu0 %v1135_v29 }
  0x2e   : > { %630 = vmatpush1.bf16.msra.mxu0 %v1136_v31  ;;  %661 = vmatprep.mubr.bf16.mxu0 %v1189_v2  ;;  %v675_v2 = vld [vmem:[%s1419_s1 + $0x18] sm:$0xff] }
  0x2f   : > { %631 = vmatprep.subr.bf16.mxu0 %v1144_v33  ;;  %619 = vmatmul.mubr.bf16.vlgmr.msra.gmra.mxu1 %v1135_v29 }
  0x30   : > { %753 = vmatprep.mubr.f32.mxu1 %v1190_v50 }
  0x32   : > { %632 = vmatpush1.bf16.msra.mxu0 %v1142_v35 }
  0x33   : > { %633 = vmatprep.subr.bf16.mxu0 %v1150_v37 }
  0x36   : > { %634 = vmatpush1.bf16.msra.mxu0 %v1148_v39 }
  0x37   : > { %635 = vmatprep.subr.bf16.mxu0 %v1156_v40 }
  0x3a   : > { %636 = vmatpush1.bf16.msra.mxu0 %v1154_v41 }
  0x3b   : > { %637 = vmatprep.subr.bf16.mxu0 %v1162_v42 }
  0x3e   : > { %638 = vmatpush1.bf16.msra.mxu0 %v1160_v43 }
  0x3f   : > { %639 = vmatprep.subr.bf16.mxu0 %v1168_v44 }
  0x42   : > { %640 = vmatpush1.bf16.msra.mxu0 %v1166_v45 }
  0x43   : > { %641 = vmatprep.subr.bf16.mxu0 %v1174_v46 }
  0x46   : > { %642 = vmatpush1.bf16.msra.mxu0 %v1172_v47  ;;  %v1191_v47 = vmov 1966171168  }
  0x47   : > { %643 = vmatprep.subr.bf16.mxu0 %v1180_v48  ;;  %v866_v48 = vunpack.c.l.s4 %v1191_v47 }
  0x4a   : > { %644 = vmatpush1.bf16.msra.mxu0 %v1178_v49 }
  0x4d   : > { %662 = vmatmul.mubr.bf16.vlgmr.msra.gmra.mxu0 %v1135_v29 }
  0xed   : > { %v577_v51 = vpop.f32.mrf.mxu0 }
  0xef   : > { %v579_v52 = vpop.f32.mrf.mxu0  ;;  %v620_v55 = vpop.f32.mrf.mxu1 }
  0xf1   : > { %v581_v53 = vpop.f32.mrf.mxu0  ;;  %v622_v57 = vpop.f32.mrf.mxu1 }
  0xf3   : > { %v583_v54 = vpop.f32.mrf.mxu0  ;;  %v624_v60 = vpop.f32.mrf.mxu1 }
  0xf5   : > { %v626_v62 = vpop.f32.mrf.mxu1 }
 0x10d   : > { %v663_v56 = vpop.f32.mrf.mxu0 }
 0x10f   : > { %v665_v58 = vpop.f32.mrf.mxu0 }
 0x111   : > { %v667_v59 = vpop.f32.mrf.mxu0 }
 0x113   : > { %v669_v61 = vpop.f32.mrf.mxu0 }
 0x114   : > { %709 = vmatprep.subr.mxu1 %v669_v61 }
 0x115   : > { %710 = vmatpush1.msra.mxu1 %v667_v59 }
 0x116   : > { %711 = vmatprep.subr.mxu1 %v665_v58  ;;  %v867_v58 = vunpack.c.0.s8 %v866_v48 }
 0x117   : > { %712 = vmatpush1.msra.mxu1 %v663_v56 }
 0x118   : > { %713 = vmatprep.subr.mxu1 %v626_v62 }
 0x119   : > { %714 = vmatpush1.msra.mxu1 %v624_v60 }
 0x11a   : > { %715 = vmatprep.subr.mxu1 %v622_v57 }
 0x11b   : > { %716 = vmatpush1.msra.mxu1 %v620_v55 }
 0x11c   : > { %717 = vmatprep.subr.mxu1 %v583_v54 }
 0x11d   : > { %718 = vmatpush1.msra.mxu1 %v581_v53 }
 0x11e   : > { %719 = vmatprep.subr.mxu1 %v579_v52  ;;  %v868_v52 = vlaneseq }
 0x11f   : > { %720 = vmatpush1.msra.mxu1 %v577_v51 }
 0x120   : > { %1081 = vmatmul.mubr.msk.f32.vlgmr.msra.gmra.mxu1 %vm676_vm0, %v672_v63  ;;  %v869_v62 = vshrl.u32 %v868_v52, 7  ;;  %vm882_vm1 = vcmp.lt.s32.totalorder %v868_v52, 256 }
 0x121   : > { %759 = vmatprep.mubr.f32.mxu1 %v1190_v50 }
 0x124   : > { %1082 = vmatmul.mubr.msk.f32.gmra.mxu1 %vm676_vm0, %v673_v0 }
 0x125   : > { %765 = vmatprep.mubr.f32.mxu1 %v1190_v50 }
 0x128   : > { %1083 = vmatmul.mubr.msk.f32.gmra.mxu1 %vm676_vm0, %v674_v1 }
 0x129   : > { %771 = vmatprep.mubr.f32.mxu1 %v1190_v50 }
 0x12c   : > { %1084 = vmatmul.mubr.msk.f32.gmra.mxu1 %vm676_vm0, %v675_v2 }
 0x1e0   : > { %v755_v3 = vpop.f32.mrf.mxu1 }
 0x1e1   : > { %v778_v5 = vmax.f32 %v755_v3, 0.0 }
 0x1e2   : > { %v757_v4 = vpop.f32.mrf.mxu1 }
 0x1e3   : > { %v779_v6 = vmax.f32 %v757_v4, 0.0  ;;  %v834_v17 = vmul.f32 %v778_v5, %v778_v5 }
 0x1e4   : > { %v761_v7 = vpop.f32.mrf.mxu1 }
 0x1e5   : > { %v1093_v8 = vpack.c.bf16 %v779_v6, %v778_v5  ;;  %v780_v9 = vmax.f32 %v761_v7, 0.0  ;;  %v835_v28 = vmul.f32 %v779_v6, %v779_v6 }
 0x1e6   : > { %v763_v10 = vpop.f32.mrf.mxu1 }
 0x1e7   : > { %810 = vst [vmem:[%s1402_s15] sm:$0xff] %v1093_v8  ;;  %v781_v11 = vmax.f32 %v763_v10, 0.0  ;;  %v836_v13 = vmul.f32 %v780_v9, %v780_v9  ;;  %v814_v18 = vadd.f32 %v780_v9, %v778_v5  ;;  %v870_v5 = vsub.s32 %v867_v58, %v869_v62 }
 0x1e8   : > { %v767_v12 = vpop.f32.mrf.mxu1 }
 0x1e9   : > { %v1094_v14 = vpack.c.bf16 %v781_v11, %v780_v9  ;;  %v782_v15 = vmax.f32 %v767_v12, 0.0  ;;  %v823_v20 = vadd.f32 %v781_v11, %v779_v6  ;;  %v837_v21 = vmul.f32 %v781_v11, %v781_v11 }
 0x1ea   : > { %v769_v16 = vpop.f32.mrf.mxu1  ;;  %v842_v24 = vadd.f32 %v836_v13, %v834_v17 }
 0x1eb   : > { %811 = vst [vmem:[%s1402_s15 + $0x8] sm:$0xff] %v1094_v14  ;;  %v783_v19 = vmax.f32 %v769_v16, 0.0  ;;  %v838_v22 = vmul.f32 %v782_v15, %v782_v15  ;;  %v815_v25 = vadd.f32 %v814_v18, %v782_v15  ;;  %v851_v36 = vadd.f32 %v837_v21, %v835_v28 }
 0x1ec   : > { %v773_v23 = vpop.f32.mrf.mxu1 }
 0x1ed   : > { %v1095_v26 = vpack.c.bf16 %v783_v19, %v782_v15  ;;  %v784_v27 = vmax.f32 %v773_v23, 0.0  ;;  %v824_v29 = vadd.f32 %v823_v20, %v783_v19  ;;  %v839_v30 = vmul.f32 %v783_v19, %v783_v19 }
 0x1ee   : > { %v775_v31 = vpop.f32.mrf.mxu1  ;;  %v843_v32 = vadd.f32 %v842_v24, %v838_v22 }
 0x1ef   : > { %812 = vst [vmem:[%s1402_s15 + $0x10] sm:$0xff] %v1095_v26  ;;  %v816_v33 = vadd.f32 %v815_v25, %v784_v27  ;;  %v840_v34 = vmul.f32 %v784_v27, %v784_v27  ;;  %v785_v35 = vmax.f32 %v775_v31, 0.0  ;;  %v852_v41 = vadd.f32 %v851_v36, %v839_v30 }
 0x1f1   : > { %v817_v37 = vrot.slane %v816_v33, 4  ;;  %v844_v38 = vadd.f32 %v843_v32, %v840_v34  ;;  %v1096_v39 = vpack.c.bf16 %v785_v35, %v784_v27  ;;  %v825_v40 = vadd.f32 %v824_v29, %v785_v35 }
 0x1f2   : > { %v841_v42 = vmul.f32 %v785_v35, %v785_v35 }
 0x1f3   : > { %v818_v43 = vadd.f32 %v817_v37, %v816_v33  ;;  %v845_v44 = vrot.slane %v844_v38, 4  ;;  %813 = vst [vmem:[%s1402_s15 + $0x18] sm:$0xff] %v1096_v39  ;;  %v826_v45 = vrot.slane %v825_v40, 4 }
 0x1f4   : > { %v853_v46 = vadd.f32 %v852_v41, %v841_v42 }
 0x1f5   : > { %v819_v49 = vrot.slane %v818_v43, 2  ;;  %v846_v50 = vadd.f32 %v845_v44, %v844_v38  ;;  %v827_v51 = vadd.f32 %v826_v45, %v825_v40 }
 0x1f6   : > { %v854_v53 = vrot.slane %v853_v46, 4 }
 0x1f7   : > { %v820_v54 = vadd.f32 %v819_v49, %v818_v43  ;;  %v847_v55 = vrot.slane %v846_v50, 2  ;;  %v828_v56 = vrot.slane %v827_v51, 2 }
 0x1f8   : > { %v855_v57 = vadd.f32 %v854_v53, %v853_v46 }
 0x1f9   : > { %v821_v59 = vrot.slane %v820_v54, 1  ;;  %v848_v60 = vadd.f32 %v847_v55, %v846_v50  ;;  %v829_v61 = vadd.f32 %v828_v56, %v827_v51 }
 0x1fa   : > { %v856_v63 = vrot.slane %v855_v57, 2 }
 0x1fb   : > { %v830_v0 = vrot.slane %v829_v61, 1  ;;  %v849_v1 = vrot.slane %v848_v60, 1  ;;  %v822_v3 = vadd.f32 %v821_v59, %v820_v54 }
 0x1fc   : > { %v857_v2 = vadd.f32 %v856_v63, %v855_v57 }
 0x1fd   : > { %v831_v4 = vadd.f32 %v830_v0, %v829_v61  ;;  %v850_v8 = vadd.f32 %v849_v1, %v848_v60 }
 0x1fe   : > { %v858_v6 = vrot.slane %v857_v2, 1 }
 0x1ff   : > { %v864_v7 = vcombine.low %v822_v3, %v831_v4 }
 0x200   : > { %v859_v9 = vadd.f32 %v858_v6, %v857_v2 }
 0x201   : > { %v871_v10 = vrot.slane %v864_v7, %v870_v5 }
 0x202   : > { %v887_v11 = vcombine.low %v850_v8, %v859_v9 }
 0x203   : > { %v878_v12 = vrot.slane %v871_v10, %v870_v5 }
 0x204   : > { %v894_v13 = vrot.slane %v887_v11, %v870_v5 }
 0x205   : > { %884 = vst.msk [vmem:[%s241_s21] sm:$0x3] %vm882_vm1, %v878_v12 }
 0x206   : > { %v901_v14 = vrot.slane %v894_v13, %v870_v5 }
 0x208   : > { %903 = vst.msk [vmem:[%s245_s24] sm:$0x3] %vm882_vm1, %v901_v14 }
 0x209 PF: > { %s16_s18 = sadd.s32 1, %s1187_s18  }
 0x20a   : > { %p13_p4 = scmp.ge.s32.totalorder %s16_s18, 4  }
 0x20c   :  { %15 = sbr.rel (!%p13_p4) target bundleno = 1 (0x1), region = 86 }

</bundles_post_ra>
